<compile_context>
chip_gen: v5e
topology: v5e:2x2
jax: 0.10.0
libtpu: 0.0.40
codegen_flags: <defaults>
</compile_context>

<pallas_src>
import jax
import jax.numpy as jnp
from jax.experimental import pallas as pl
from jax.experimental.pallas import tpu as pltpu


_MXU_MIN_M = 8  # below this, M^2 scalar-FMAs on the VPU stay hidden under HBM


def _vmem_budget():
    """Generation-aware (max block bytes, scoped-VMEM limit)."""
    try:
        info = pltpu.get_tpu_info()
        vmem_phys = int(getattr(info, "vmem_capacity_bytes", 0)) or (64 << 20)
    except Exception:
        vmem_phys = 64 << 20  # conservative fallback: assume v7x-sized VMEM
    if vmem_phys <= (64 << 20):
        # v7x: 64 MiB physical per TC.  Double-buffered in/out (~4x block)
        # plus f32 temporaries must leave headroom.
        return 3 << 20, 44 << 20
    # v5e / v6e: 128 MiB physical.  Big slabs amortize ~0.35us/step overhead.
    return 8 << 20, 64 << 20


def _make_vpu_kernel(num_modules):
    """Tiny-M path: SMEM scalar weights, scalar x vreg FMAs, f32 accumulate."""

    def kernel(sm_ref, x_ref, o_ref):
        # sm_ref: (M, M) row-softmaxed weights in SMEM (f32 scalars).
        # x_ref / o_ref: (bB, M, TF) slabs in VMEM.
        for m in range(num_modules):
            acc = sm_ref[m, 0] * x_ref[:, 0, :].astype(jnp.float32)
            for n in range(1, num_modules):
                # Per-row upcast only: never materialize a full f32 block copy.
                acc = acc + sm_ref[m, n] * x_ref[:, n, :].astype(jnp.float32)
            o_ref[:, m, :] = acc.astype(o_ref.dtype)

    return kernel


def _mxu_kernel(sm_ref, x_ref, o_ref):
    """M >= 8 path: (M,M)@(M,TF) on the MXU, f32 accumulation."""
    sm = sm_ref[...]
    x = x_ref[...]
    for b in range(x.shape[0]):  # bB is small & static (usually 1)
        o_ref[b] = jnp.dot(
            sm, x[b], preferred_element_type=jnp.float32
        ).astype(o_ref.dtype)


def task_correlation_learner(corr_matrix, module_outputs):
    """Forward pass of TaskCorrelationLearner.

    corr_matrix:    (M, M) learnable correlation matrix (pre-softmax).
    module_outputs: (B, M, C, H, W).
    Returns:        (B, M, C, H, W).
    """
    B, M, C, H, W = module_outputs.shape
    F = C * H * W
    dtype = module_outputs.dtype
    itemsize = jnp.dtype(dtype).itemsize

    # Contiguous collapse: free, no extra HBM pass.
    x = module_outputs.reshape(B, M, F)

    max_block_bytes, vmem_limit = _vmem_budget()

    # Feature tiling: budget-sized, 256-aligned tile (lane-dense and friendly
    # to the 256-wide MXU); ragged tail handled by Pallas' masked partial
    # edge block, never by wrapper pad/slice.
    tile_cap = max(256, (max_block_bytes // max(1, M * itemsize)) // 256 * 256)

    if F <= tile_cap:
        tile_f = F            # full array extent: allowed even if F % 128 != 0
        nf = 1
        # Fold batch rows into the block to keep slabs large, but leave >= 2
        # grid steps so both v7x TensorCores get work.
        bB = max(1, min(B, max_block_bytes // max(1, M * F * itemsize)))
        if B > 1:
            bB = min(bB, max(1, B // 2))
        nb = pl.cdiv(B, bB)
    else:
        tile_f = tile_cap
        nf = pl.cdiv(F, tile_f)   # tail tile is partial; Pallas masks the store
        bB = 1
        nb = B

    # Softmax hoisted out of the per-tile kernel (done exactly once, f32).
    sm = jax.nn.softmax(corr_matrix.astype(jnp.float32), axis=1)

    use_mxu = M >= _MXU_MIN_M
    if use_mxu:
        kernel = _mxu_kernel
        # MXU consumes the native activation dtype with f32 accumulation.
        # For bf16 activations the cast of the row-softmax weights drifts row
        # sums by <~0.5% vs an f32 reference (documented tolerance).
        sm_arg = sm.astype(dtype)
        sm_spec = pl.BlockSpec((M, M), lambda i, j: (0, 0))
    else:
        kernel = _make_vpu_kernel(M)
        sm_arg = sm
        # Weights as SMEM scalars: scalar x vreg multiplies, no cross-lane
        # broadcasts and no sub-(8,128) VMEM tile.
        sm_spec = pl.BlockSpec(memory_space=pltpu.MemorySpace.SMEM)

    cost = pl.CostEstimate(
        flops=2 * B * M * M * F,
        transcendentals=0,
        bytes_accessed=2 * B * M * F * itemsize + M * M * 4,
    )

    out = pl.pallas_call(
        kernel,
        out_shape=jax.ShapeDtypeStruct((B, M, F), dtype),
        grid=(nb, nf),
        in_specs=[
            sm_spec,
            pl.BlockSpec((bB, M, tile_f), lambda i, j: (i, 0, j)),
        ],
        out_specs=pl.BlockSpec((bB, M, tile_f), lambda i, j: (i, 0, j)),
        compiler_params=pltpu.CompilerParams(
            dimension_semantics=("parallel", "parallel"),
            vmem_limit_bytes=vmem_limit,
        ),
        cost_estimate=cost,
    )(sm_arg, x)

    return out.reshape(B, M, C, H, W)


# TODO(synk): TaskCorrelationLearner.expand() mutates the nn.Parameter shape
# (training-time bookkeeping); it has no kernel equivalent and is not part of
# the forward pass.

if __name__ == "__main__":
    # Small shapes consistent with the module's forward:
    #   batch=2, num_modules=4, channels=4, height=8, width=8 -> F = 256
    B, M, C, H, W = 2, 4, 4, 8, 8

    key = jax.random.PRNGKey(0)
    x = jax.random.normal(key, (B, M, C, H, W), dtype=jnp.float32)

    # Deterministic parameter init, matching nn.Parameter(torch.eye(num_modules)).
    corr_matrix = jnp.eye(M, dtype=jnp.float32)

    out = task_correlation_learner(corr_matrix, x)
    out = jax.block_until_ready(out)

    # Pure-JAX reference check.
    sm_ref = jax.nn.softmax(corr_matrix, axis=1)
    ref = jnp.einsum("mn,bnf->bmf", sm_ref, x.reshape(B, M, -1)).reshape(B, M, C, H, W)
    assert out.shape == (B, M, C, H, W)
    assert jnp.allclose(out, ref, atol=1e-5, rtol=1e-5)

    print("KERNEL_OK")
</pallas_src>

<mosaic_0001>
module attributes {stable_mosaic.version = 11 : i64} {
  func.func @kernel(%arg0: i32, %arg1: i32, %arg2: memref<4x4xf32, #tpu.memory_space<smem>>, %arg3: memref<1x4x256xf32, #tpu.memory_space<vmem>>, %arg4: memref<1x4x256xf32, #tpu.memory_space<vmem>>) attributes {dimension_semantics = [#tpu.dimension_semantics<parallel>, #tpu.dimension_semantics<parallel>], iteration_bounds = array<i64: 2, 1>, scalar_prefetch = 0 : i64, scratch_operands = 0 : i64, tpu.core_type = #tpu.core_type<tc>, window_params = [{transform_indices = @transform_0, window_bounds = array<i64: 4, 4>}, {transform_indices = @transform_1, window_bounds = array<i64: 1, 4, 256>}, {transform_indices = @transform_2, window_bounds = array<i64: 1, 4, 256>}]} {
    %c0 = arith.constant 0 : index
    %c0_0 = arith.constant 0 : index
    %0 = memref.load %arg2[%c0, %c0_0] : memref<4x4xf32, #tpu.memory_space<smem>>
    %c0_1 = arith.constant 0 : index
    %c0_2 = arith.constant 0 : index
    %c0_3 = arith.constant 0 : index
    %1 = vector.load %arg3[%c0_1, %c0_2, %c0_3] : memref<1x4x256xf32, #tpu.memory_space<vmem>>, vector<1x1x256xf32>
    %2 = vector.shape_cast %1 : vector<1x1x256xf32> to vector<1x256xf32>
    %3 = vector.broadcast %0 : f32 to vector<1x256xf32>
    %4 = arith.mulf %3, %2 : vector<1x256xf32>
    %c0_4 = arith.constant 0 : index
    %c1 = arith.constant 1 : index
    %5 = memref.load %arg2[%c0_4, %c1] : memref<4x4xf32, #tpu.memory_space<smem>>
    %c0_5 = arith.constant 0 : index
    %c1_6 = arith.constant 1 : index
    %c0_7 = arith.constant 0 : index
    %6 = vector.load %arg3[%c0_5, %c1_6, %c0_7] : memref<1x4x256xf32, #tpu.memory_space<vmem>>, vector<1x1x256xf32>
    %7 = vector.shape_cast %6 : vector<1x1x256xf32> to vector<1x256xf32>
    %8 = vector.broadcast %5 : f32 to vector<1x256xf32>
    %9 = arith.mulf %8, %7 : vector<1x256xf32>
    %10 = arith.addf %4, %9 : vector<1x256xf32>
    %c0_8 = arith.constant 0 : index
    %c2 = arith.constant 2 : index
    %11 = memref.load %arg2[%c0_8, %c2] : memref<4x4xf32, #tpu.memory_space<smem>>
    %c0_9 = arith.constant 0 : index
    %c2_10 = arith.constant 2 : index
    %c0_11 = arith.constant 0 : index
    %12 = vector.load %arg3[%c0_9, %c2_10, %c0_11] : memref<1x4x256xf32, #tpu.memory_space<vmem>>, vector<1x1x256xf32>
    %13 = vector.shape_cast %12 : vector<1x1x256xf32> to vector<1x256xf32>
    %14 = vector.broadcast %11 : f32 to vector<1x256xf32>
    %15 = arith.mulf %14, %13 : vector<1x256xf32>
    %16 = arith.addf %10, %15 : vector<1x256xf32>
    %c0_12 = arith.constant 0 : index
    %c3 = arith.constant 3 : index
    %17 = memref.load %arg2[%c0_12, %c3] : memref<4x4xf32, #tpu.memory_space<smem>>
    %c0_13 = arith.constant 0 : index
    %c3_14 = arith.constant 3 : index
    %c0_15 = arith.constant 0 : index
    %18 = vector.load %arg3[%c0_13, %c3_14, %c0_15] : memref<1x4x256xf32, #tpu.memory_space<vmem>>, vector<1x1x256xf32>
    %19 = vector.shape_cast %18 : vector<1x1x256xf32> to vector<1x256xf32>
    %20 = vector.broadcast %17 : f32 to vector<1x256xf32>
    %21 = arith.mulf %20, %19 : vector<1x256xf32>
    %22 = arith.addf %16, %21 : vector<1x256xf32>
    %c0_16 = arith.constant 0 : index
    %c0_17 = arith.constant 0 : index
    %c0_18 = arith.constant 0 : index
    %23 = vector.load %arg4[%c0_16, %c0_17, %c0_18] : memref<1x4x256xf32, #tpu.memory_space<vmem>>, vector<1x1x256xf32>
    %24 = vector.shape_cast %23 : vector<1x1x256xf32> to vector<1x256xf32>
    %25 = vector.shape_cast %22 : vector<1x256xf32> to vector<1x1x256xf32>
    tpu.vector_store %arg4[%c0_16, %c0_17, %c0_18], %25 {strides = array<i32>} : memref<1x4x256xf32, #tpu.memory_space<vmem>>, vector<1x1x256xf32>,
    %c1_19 = arith.constant 1 : index
    %c0_20 = arith.constant 0 : index
    %26 = memref.load %arg2[%c1_19, %c0_20] : memref<4x4xf32, #tpu.memory_space<smem>>
    %c0_21 = arith.constant 0 : index
    %c0_22 = arith.constant 0 : index
    %c0_23 = arith.constant 0 : index
    %27 = vector.load %arg3[%c0_21, %c0_22, %c0_23] : memref<1x4x256xf32, #tpu.memory_space<vmem>>, vector<1x1x256xf32>
    %28 = vector.shape_cast %27 : vector<1x1x256xf32> to vector<1x256xf32>
    %29 = vector.broadcast %26 : f32 to vector<1x256xf32>
    %30 = arith.mulf %29, %28 : vector<1x256xf32>
    %c1_24 = arith.constant 1 : index
    %c1_25 = arith.constant 1 : index
    %31 = memref.load %arg2[%c1_24, %c1_25] : memref<4x4xf32, #tpu.memory_space<smem>>
    %c0_26 = arith.constant 0 : index
    %c1_27 = arith.constant 1 : index
    %c0_28 = arith.constant 0 : index
    %32 = vector.load %arg3[%c0_26, %c1_27, %c0_28] : memref<1x4x256xf32, #tpu.memory_space<vmem>>, vector<1x1x256xf32>
    %33 = vector.shape_cast %32 : vector<1x1x256xf32> to vector<1x256xf32>
    %34 = vector.broadcast %31 : f32 to vector<1x256xf32>
    %35 = arith.mulf %34, %33 : vector<1x256xf32>
    %36 = arith.addf %30, %35 : vector<1x256xf32>
    %c1_29 = arith.constant 1 : index
    %c2_30 = arith.constant 2 : index
    %37 = memref.load %arg2[%c1_29, %c2_30] : memref<4x4xf32, #tpu.memory_space<smem>>
    %c0_31 = arith.constant 0 : index
    %c2_32 = arith.constant 2 : index
    %c0_33 = arith.constant 0 : index
    %38 = vector.load %arg3[%c0_31, %c2_32, %c0_33] : memref<1x4x256xf32, #tpu.memory_space<vmem>>, vector<1x1x256xf32>
    %39 = vector.shape_cast %38 : vector<1x1x256xf32> to vector<1x256xf32>
    %40 = vector.broadcast %37 : f32 to vector<1x256xf32>
    %41 = arith.mulf %40, %39 : vector<1x256xf32>
    %42 = arith.addf %36, %41 : vector<1x256xf32>
    %c1_34 = arith.constant 1 : index
    %c3_35 = arith.constant 3 : index
    %43 = memref.load %arg2[%c1_34, %c3_35] : memref<4x4xf32, #tpu.memory_space<smem>>
    %c0_36 = arith.constant 0 : index
    %c3_37 = arith.constant 3 : index
    %c0_38 = arith.constant 0 : index
    %44 = vector.load %arg3[%c0_36, %c3_37, %c0_38] : memref<1x4x256xf32, #tpu.memory_space<vmem>>, vector<1x1x256xf32>
    %45 = vector.shape_cast %44 : vector<1x1x256xf32> to vector<1x256xf32>
    %46 = vector.broadcast %43 : f32 to vector<1x256xf32>
    %47 = arith.mulf %46, %45 : vector<1x256xf32>
    %48 = arith.addf %42, %47 : vector<1x256xf32>
    %c0_39 = arith.constant 0 : index
    %c1_40 = arith.constant 1 : index
    %c0_41 = arith.constant 0 : index
    %49 = vector.load %arg4[%c0_39, %c1_40, %c0_41] : memref<1x4x256xf32, #tpu.memory_space<vmem>>, vector<1x1x256xf32>
    %50 = vector.shape_cast %49 : vector<1x1x256xf32> to vector<1x256xf32>
    %51 = vector.shape_cast %48 : vector<1x256xf32> to vector<1x1x256xf32>
    tpu.vector_store %arg4[%c0_39, %c1_40, %c0_41], %51 {strides = array<i32>} : memref<1x4x256xf32, #tpu.memory_space<vmem>>, vector<1x1x256xf32>,
    %c2_42 = arith.constant 2 : index
    %c0_43 = arith.constant 0 : index
    %52 = memref.load %arg2[%c2_42, %c0_43] : memref<4x4xf32, #tpu.memory_space<smem>>
    %c0_44 = arith.constant 0 : index
    %c0_45 = arith.constant 0 : index
    %c0_46 = arith.constant 0 : index
    %53 = vector.load %arg3[%c0_44, %c0_45, %c0_46] : memref<1x4x256xf32, #tpu.memory_space<vmem>>, vector<1x1x256xf32>
    %54 = vector.shape_cast %53 : vector<1x1x256xf32> to vector<1x256xf32>
    %55 = vector.broadcast %52 : f32 to vector<1x256xf32>
    %56 = arith.mulf %55, %54 : vector<1x256xf32>
    %c2_47 = arith.constant 2 : index
    %c1_48 = arith.constant 1 : index
    %57 = memref.load %arg2[%c2_47, %c1_48] : memref<4x4xf32, #tpu.memory_space<smem>>
    %c0_49 = arith.constant 0 : index
    %c1_50 = arith.constant 1 : index
    %c0_51 = arith.constant 0 : index
    %58 = vector.load %arg3[%c0_49, %c1_50, %c0_51] : memref<1x4x256xf32, #tpu.memory_space<vmem>>, vector<1x1x256xf32>
    %59 = vector.shape_cast %58 : vector<1x1x256xf32> to vector<1x256xf32>
    %60 = vector.broadcast %57 : f32 to vector<1x256xf32>
    %61 = arith.mulf %60, %59 : vector<1x256xf32>
    %62 = arith.addf %56, %61 : vector<1x256xf32>
    %c2_52 = arith.constant 2 : index
    %c2_53 = arith.constant 2 : index
    %63 = memref.load %arg2[%c2_52, %c2_53] : memref<4x4xf32, #tpu.memory_space<smem>>
    %c0_54 = arith.constant 0 : index
    %c2_55 = arith.constant 2 : index
    %c0_56 = arith.constant 0 : index
    %64 = vector.load %arg3[%c0_54, %c2_55, %c0_56] : memref<1x4x256xf32, #tpu.memory_space<vmem>>, vector<1x1x256xf32>
    %65 = vector.shape_cast %64 : vector<1x1x256xf32> to vector<1x256xf32>
    %66 = vector.broadcast %63 : f32 to vector<1x256xf32>
    %67 = arith.mulf %66, %65 : vector<1x256xf32>
    %68 = arith.addf %62, %67 : vector<1x256xf32>
    %c2_57 = arith.constant 2 : index
    %c3_58 = arith.constant 3 : index
    %69 = memref.load %arg2[%c2_57, %c3_58] : memref<4x4xf32, #tpu.memory_space<smem>>
    %c0_59 = arith.constant 0 : index
    %c3_60 = arith.constant 3 : index
    %c0_61 = arith.constant 0 : index
    %70 = vector.load %arg3[%c0_59, %c3_60, %c0_61] : memref<1x4x256xf32, #tpu.memory_space<vmem>>, vector<1x1x256xf32>
    %71 = vector.shape_cast %70 : vector<1x1x256xf32> to vector<1x256xf32>
    %72 = vector.broadcast %69 : f32 to vector<1x256xf32>
    %73 = arith.mulf %72, %71 : vector<1x256xf32>
    %74 = arith.addf %68, %73 : vector<1x256xf32>
    %c0_62 = arith.constant 0 : index
    %c2_63 = arith.constant 2 : index
    %c0_64 = arith.constant 0 : index
    %75 = vector.load %arg4[%c0_62, %c2_63, %c0_64] : memref<1x4x256xf32, #tpu.memory_space<vmem>>, vector<1x1x256xf32>
    %76 = vector.shape_cast %75 : vector<1x1x256xf32> to vector<1x256xf32>
    %77 = vector.shape_cast %74 : vector<1x256xf32> to vector<1x1x256xf32>
    tpu.vector_store %arg4[%c0_62, %c2_63, %c0_64], %77 {strides = array<i32>} : memref<1x4x256xf32, #tpu.memory_space<vmem>>, vector<1x1x256xf32>,
    %c3_65 = arith.constant 3 : index
    %c0_66 = arith.constant 0 : index
    %78 = memref.load %arg2[%c3_65, %c0_66] : memref<4x4xf32, #tpu.memory_space<smem>>
    %c0_67 = arith.constant 0 : index
    %c0_68 = arith.constant 0 : index
    %c0_69 = arith.constant 0 : index
    %79 = vector.load %arg3[%c0_67, %c0_68, %c0_69] : memref<1x4x256xf32, #tpu.memory_space<vmem>>, vector<1x1x256xf32>
    %80 = vector.shape_cast %79 : vector<1x1x256xf32> to vector<1x256xf32>
    %81 = vector.broadcast %78 : f32 to vector<1x256xf32>
    %82 = arith.mulf %81, %80 : vector<1x256xf32>
    %c3_70 = arith.constant 3 : index
    %c1_71 = arith.constant 1 : index
    %83 = memref.load %arg2[%c3_70, %c1_71] : memref<4x4xf32, #tpu.memory_space<smem>>
    %c0_72 = arith.constant 0 : index
    %c1_73 = arith.constant 1 : index
    %c0_74 = arith.constant 0 : index
    %84 = vector.load %arg3[%c0_72, %c1_73, %c0_74] : memref<1x4x256xf32, #tpu.memory_space<vmem>>, vector<1x1x256xf32>
    %85 = vector.shape_cast %84 : vector<1x1x256xf32> to vector<1x256xf32>
    %86 = vector.broadcast %83 : f32 to vector<1x256xf32>
    %87 = arith.mulf %86, %85 : vector<1x256xf32>
    %88 = arith.addf %82, %87 : vector<1x256xf32>
    %c3_75 = arith.constant 3 : index
    %c2_76 = arith.constant 2 : index
    %89 = memref.load %arg2[%c3_75, %c2_76] : memref<4x4xf32, #tpu.memory_space<smem>>
    %c0_77 = arith.constant 0 : index
    %c2_78 = arith.constant 2 : index
    %c0_79 = arith.constant 0 : index
    %90 = vector.load %arg3[%c0_77, %c2_78, %c0_79] : memref<1x4x256xf32, #tpu.memory_space<vmem>>, vector<1x1x256xf32>
    %91 = vector.shape_cast %90 : vector<1x1x256xf32> to vector<1x256xf32>
    %92 = vector.broadcast %89 : f32 to vector<1x256xf32>
    %93 = arith.mulf %92, %91 : vector<1x256xf32>
    %94 = arith.addf %88, %93 : vector<1x256xf32>
    %c3_80 = arith.constant 3 : index
    %c3_81 = arith.constant 3 : index
    %95 = memref.load %arg2[%c3_80, %c3_81] : memref<4x4xf32, #tpu.memory_space<smem>>
    %c0_82 = arith.constant 0 : index
    %c3_83 = arith.constant 3 : index
    %c0_84 = arith.constant 0 : index
    %96 = vector.load %arg3[%c0_82, %c3_83, %c0_84] : memref<1x4x256xf32, #tpu.memory_space<vmem>>, vector<1x1x256xf32>
    %97 = vector.shape_cast %96 : vector<1x1x256xf32> to vector<1x256xf32>
    %98 = vector.broadcast %95 : f32 to vector<1x256xf32>
    %99 = arith.mulf %98, %97 : vector<1x256xf32>
    %100 = arith.addf %94, %99 : vector<1x256xf32>
    %c0_85 = arith.constant 0 : index
    %c3_86 = arith.constant 3 : index
    %c0_87 = arith.constant 0 : index
    %101 = vector.load %arg4[%c0_85, %c3_86, %c0_87] : memref<1x4x256xf32, #tpu.memory_space<vmem>>, vector<1x1x256xf32>
    %102 = vector.shape_cast %101 : vector<1x1x256xf32> to vector<1x256xf32>
    %103 = vector.shape_cast %100 : vector<1x256xf32> to vector<1x1x256xf32>
    tpu.vector_store %arg4[%c0_85, %c3_86, %c0_87], %103 {strides = array<i32>} : memref<1x4x256xf32, #tpu.memory_space<vmem>>, vector<1x1x256xf32>,
    return
  }
  func.func @transform_0(%arg0: i32, %arg1: i32) -> (i32, i32) {
    %c0_i32 = arith.constant 0 : i32
    %c0_i32_0 = arith.constant 0 : i32
    %c0_i32_1 = arith.constant 0 : i32
    return %c0_i32, %c0_i32_0 : i32, i32
  }
  func.func @transform_1(%arg0: i32, %arg1: i32) -> (i32, i32, i32) {
    %c0_i32 = arith.constant 0 : i32
    %c0_i32_0 = arith.constant 0 : i32
    return %arg0, %c0_i32, %arg1 : i32, i32, i32
  }
  func.func @transform_2(%arg0: i32, %arg1: i32) -> (i32, i32, i32) {
    %c0_i32 = arith.constant 0 : i32
    %c0_i32_0 = arith.constant 0 : i32
    return %arg0, %c0_i32, %arg1 : i32, i32, i32
  }
}

</mosaic_0001>

<bundles_post_ra>
// kernel: tpu_custom_call.1
= control target key start
LH: loop header
LB: loop body
LE: loop exit
PB: predicated region body
PF: predicated region fallthrough
CT: control target
= control target key end

     0   :  { %7 = vsyncpa [#allocation5], 0  ;;  %s879_s0 = inlined_call_operand.hbm [shape: f32[4,4], index: 0, kind: input, shape index: {}]   ;;  %s880_s1 = inlined_call_operand.hbm [shape: f32[2,4,256], index: 1, kind: input, shape index: {}]   ;;  %s881_s2 = inlined_call_operand.hbm [shape: f32[2,4,256], index: 2, kind: output, shape index: {}]  }
   0x1   :  { %8 = vsyncpa [#allocation3], 0 }
   0x2   :  { %10 = vsyncpa [#allocation3 + $0x1], 0 }
   0x3   :  { %11 = vsyncpa [#allocation4], 0 }
   0x4   :  { %13 = vsyncpa [#allocation4 + $0x1], 0  ;;  %s672_s9 = smov 0   ;;  %s674_s10 = smov 0  }
   0x5   :  { %s676_s11 = smov 0   ;;  %s678_s12 = smov 0  }
   0x6   :  { %s680_s13 = smov 0   ;;  %s682_s14 = smov 0  }
   0x7 LB: > { %s401_s15 = sadd.s32 4294967295, %s654_s14   ;;  %s402_s16 = sadd.s32 4294967294, %s654_s14   ;;  %s654_s14 = sphi %s682_s14, %s19_s14   ;;  %s650_s13 = sphi %s680_s13, %s895_s13   ;;  %s646_s12 = sphi %s678_s12, %s894_s12   ;;  %s642_s11 = sphi %s676_s11, %s893_s11   ;;  %s638_s10 = sphi %s674_s10, %s892_s10   ;;  %s634_s9 = sphi %s672_s9, %s891_s9  }
   0x8   : > { %p74_p0 = scmp.ne.s32.totalorder %s638_s10, %s634_s9  ;;  %p706_p1 = scmp.eq.s32.totalorder %s401_s15, 0 }
   0x9   : > { %p710_p2 = scmp.eq.s32.totalorder %s401_s15, 1  ;;  %p106_p3 = scmp.eq.s32.totalorder %s402_s16, 1 }
   0xa   : > { %p716_p4 = por %p706_p1, %p74_p0  ;;  %p403_p5 = scmp.ge.s32.totalorder %s654_s14, 1 }
   0xb   : > { %p721_p6 = por %p106_p3, %p74_p0  ;;  %p113_p7 = scmp.lt.s32.totalorder %s654_s14, 3 }
   0xc   : > { %s125_s23 = sshll.u32 %s879_s0, 4  ;;  %s31_s25 = sadd.s32 1, %s650_s13  ;;  %s126_s23 = int_to_ptr.hbm [resolvable:$true] %s125_s23 }
   0xd   : > { %p729_p8 = pnand %p403_p5, %p113_p7  ;;  %s61_s26 = sadd.s32 1, %s642_s11 }
   0xe   : > { %p33_p12 = scmp.ge.s32.totalorder %s31_s25, 2  ;;  %s656_s27 = smov [#allocation2]  }
   0xf   : > { %p458_p10 = pneg %p729_p8  ;;  %p68_p13 = scmp.ne.s32.totalorder %s642_s11, %s638_s10 }
  0x10   : > { %s897_s25 = smov (%p33_p12, %s31_s25), 0  ;;  %p69_p0 = scmp.eq.s32.totalorder %s654_s14, 0 }
  0x11   : > { %p459_p11 = pnand %p458_p10, %p706_p1  ;;  %s56_s28 = ssub.s32 %s650_s13, %s897_s25 }
  0x12   : > { %p471_p3 = scmp.lt.s32.totalorder %s654_s14, 2  ;;  %p59_p5 = scmp.eq.s32.totalorder %s56_s28, 0 }
  0x13   : > { %461 = dma.hbm_to_smem (!%p459_p11), %s126_s23, 64, %s656_s27, [#allocation5]  }
  0x14   : > { %p70_p7 = por %p69_p0, %p68_p13  ;;  %p750_p9 = por %p710_p2, %p68_p13 }
  0x15   : > { %s136_s30 = sand.u32 1, %s642_s11   ;;  %s448_s5 = sshll.u32 %s650_s13, 3 }
  0x16   : > { %s756_s3 = scalar_select %p59_p5, %s642_s11, %s61_s26  }
  0x17   : > { %s406_s4 = sshll.u32 %s136_s30, 3  ;;  %s147_s8 = scalar_lea.hbm %s880_s1, %s448_s5 }
  0x18   : > { %s140_s15 = scalar_lea.vmem [#allocation6], %s406_s4  ;;  %s149_s21 = sshll.u32 %s147_s8, 4  ;;  %s150_s21 = int_to_ptr.hbm [resolvable:$true] %s149_s21 }
  0x19   : > { %s151_s16 = sshll.u32 %s140_s15, 4  ;;  %p463_p10 = pnand %p471_p3, %p70_p7  ;;  %s152_s16 = int_to_ptr.vmem [resolvable:$true] %s151_s16 }
  0x1a   : > { %s137_s18 = scalar_lea.sflag [#allocation3], %s136_s30  ;;  %160 = sbr.rel (%p729_p8) target bundleno = 69 (0x45), region = 28 }
  0x1b   : > { %465 = dma.hbm_to_vmem [thread:$0]  (!%p463_p10), %s150_s21, 128, %s152_s16, %s137_s18  }
  0x1f   : > { %621 = dma.done.wait (%p706_p1), [#allocation5], 64  }
  0x20   : > { %623 = vsyncadd (%p706_p1), [#allocation5], 4294967232  ;;  %s771_s22 = sand.u32 1, %s638_s10  }
  0x21   : > { %s411_s23 = sshll.u32 %s771_s22, 3  ;;  %s168_s26 = scalar_lea.sflag [#allocation3], %s771_s22 }
  0x22   : > { %s777_s27 = scalar_lea.vmem [#allocation6], %s411_s23 }
  0x23   : > { %625 = dma.done.wait (%p716_p4), %s168_s26, 128  }
  0x24   : > { %627 = vsyncadd (%p716_p4), %s168_s26, 4294967168 }
  0x25   : > { %177 = sfence }
  0x26   : > { %s196_s17 = sld [smem:[#allocation2]]  ;;  %v197_v0 = vld [vmem:[%s777_s27] ss:$4 sm:$0x3]  ;;  %v218_v12 = vlaneseq }
  0x27   : > { %s413_s24 = sld [smem:[#allocation2 + $0x1]]  ;;  %v414_v1 = vld [vmem:[%s777_s27 + $0x1] ss:$4 sm:$0x3] }
  0x28   : > { %s415_s28 = sld [smem:[#allocation2 + $0x2]]  ;;  %v416_v3 = vld [vmem:[%s777_s27 + $0x2] ss:$4 sm:$0x3]  ;;  %vm804_vm0 = vcmp.lt.s32.totalorder %v218_v12, 256 }
  0x29   : > { %s417_s30 = sld [smem:[#allocation2 + $0x3]]  ;;  %v418_v6 = vld [vmem:[%s777_s27 + $0x3] ss:$4 sm:$0x3] }
  0x2a   : > { %s419_s4 = sld [smem:[#allocation2 + $0x80]]  ;;  %v224_v9 = vld [vmem:[%s777_s27] ss:$4 sm:$0x3] }
  0x2b   : > { %s420_s5 = sld [smem:[#allocation2 + $0x81]]  ;;  %v421_v13 = vld [vmem:[%s777_s27 + $0x1] ss:$4 sm:$0x3] }
  0x2c   : > { %v198_v2 = vstv %s196_s17  ;;  %s422_s6 = sld [smem:[#allocation2 + $0x82]]  ;;  %v423_v17 = vld [vmem:[%s777_s27 + $0x2] ss:$4 sm:$0x3] }
  0x2d   : > { %v199_v4 = vmul.f32 %v198_v2, %v197_v0  ;;  %v203_v5 = vstv %s413_s24  ;;  %s787_s19 = sld [smem:[#allocation2 + $0x83]]  ;;  %v425_v20 = vld [vmem:[%s777_s27 + $0x3] ss:$4 sm:$0x3]  ;;  %s818_s24 = scalar_lea.vmem [#allocation7], %s411_s23 }
  0x2e   : > { %v204_v7 = vmul.f32 %v414_v1, %v203_v5  ;;  %v209_v8 = vstv %s415_s28  ;;  %s790_s7 = sld [smem:[#allocation2 + $0x100]]  ;;  %v245_v24 = vld [vmem:[%s777_s27] ss:$4 sm:$0x3]  ;;  %s449_s28 = sshll.u32 %s646_s12, 3 }
  0x2f   : > { %v210_v10 = vmul.f32 %v416_v3, %v209_v8  ;;  %v215_v11 = vstv %s417_s30  ;;  %s793_s8 = sld [smem:[#allocation2 + $0x101]]  ;;  %v429_v28 = vld [vmem:[%s777_s27 + $0x1] ss:$4 sm:$0x3]  ;;  %s300_s30 = scalar_lea.hbm %s881_s2, %s449_s28 }
  0x30   : > { %v205_v14 = vadd.f32 %v204_v7, %v199_v4  ;;  %v216_v15 = vmul.f32 %v418_v6, %v215_v11  ;;  %v225_v16 = vstv %s419_s4  ;;  %s796_s15 = sld [smem:[#allocation2 + $0x102]]  ;;  %v431_v33 = vld [vmem:[%s777_s27 + $0x2] ss:$4 sm:$0x3]  ;;  %s302_s4 = sshll.u32 %s818_s24, 4  ;;  %s303_s4 = int_to_ptr.vmem [resolvable:$true] %s302_s4 }
  0x31   : > { %v226_v18 = vmul.f32 %v225_v16, %v224_v9  ;;  %v229_v19 = vstv %s420_s5  ;;  %s799_s16 = sld [smem:[#allocation2 + $0x103]]  ;;  %v433_v36 = vld [vmem:[%s777_s27 + $0x3] ss:$4 sm:$0x3]  ;;  %s287_s5 = scalar_lea.sflag [#allocation4], %s771_s22 }
  0x32   : > { %v211_v21 = vadd.f32 %v210_v10, %v205_v14  ;;  %v230_v22 = vmul.f32 %v421_v13, %v229_v19  ;;  %v234_v23 = vstv %s422_s6  ;;  %s802_s21 = sld [smem:[#allocation2 + $0x180]]  ;;  %v266_v40 = vld [vmem:[%s777_s27] ss:$4 sm:$0x3] }
  0x33   : > { %v235_v26 = vmul.f32 %v423_v17, %v234_v23  ;;  %v239_v27 = vstv %s787_s19  ;;  %s810_s18 = sld [smem:[#allocation2 + $0x181]]  ;;  %v437_v43 = vld [vmem:[%s777_s27 + $0x1] ss:$4 sm:$0x3] }
  0x34   : > { %v217_v29 = vadd.f32 %v216_v15, %v211_v21  ;;  %v231_v30 = vadd.f32 %v230_v22, %v226_v18  ;;  %v240_v31 = vmul.f32 %v425_v20, %v239_v27  ;;  %v246_v32 = vstv %s790_s7  ;;  %s438_s26 = sld [smem:[#allocation2 + $0x182]]  ;;  %v439_v48 = vld [vmem:[%s777_s27 + $0x2] ss:$4 sm:$0x3] }
  0x35   : > { %v247_v34 = vmul.f32 %v246_v32, %v245_v24  ;;  %v250_v35 = vstv %s793_s8  ;;  %s440_s17 = sld [smem:[#allocation2 + $0x183]]  ;;  %v441_v51 = vld [vmem:[%s777_s27 + $0x3] ss:$4 sm:$0x3]  ;;  %s304_s27 = sshll.u32 %s300_s30, 4  ;;  %s305_s27 = int_to_ptr.hbm [resolvable:$true] %s304_s27 }
  0x36   : > { %222 = vst.msk [vmem:[%s818_s24] ss:$4 sm:$0x3] %vm804_vm0, %v217_v29  ;;  %v236_v37 = vadd.f32 %v235_v26, %v231_v30  ;;  %v251_v38 = vmul.f32 %v429_v28, %v250_v35  ;;  %v255_v39 = vstv %s796_s15  ;;  %s582_s6 = sshra.s32 %s305_s27, 4  ;;  %s588_s15 = scalar_lea.hbm %s881_s2, 16  ;;  %s583_s6 = int_to_ptr.hbm [resolvable:$true] %s582_s6 }
  0x37   : > { %v256_v41 = vmul.f32 %v431_v33, %v255_v39  ;;  %v260_v42 = vstv %s799_s16  ;;  %s584_s19 = scalar_lea.hbm %s583_s6, 8  ;;  %p589_p8 = scmp.lt.s32.totalorder %s583_s6, %s881_s2 }
  0x38   : > { %v241_v44 = vadd.f32 %v240_v31, %v236_v37  ;;  %v252_v45 = vadd.f32 %v251_v38, %v247_v34  ;;  %v261_v46 = vmul.f32 %v433_v36, %v260_v42  ;;  %v267_v47 = vstv %s802_s21  ;;  %p585_p1 = scmp.ne.s32.totalorder %s583_s6, %s584_s19  ;;  %p590_p11 = scmp.lt.s32.totalorder %s588_s15, %s584_s19 }
  0x39   : > { %v268_v49 = vmul.f32 %v267_v47, %v266_v40  ;;  %v271_v50 = vstv %s810_s18 }
  0x3a   : > { %426 = vst.msk [vmem:[%s818_s24 + $0x1] ss:$4 sm:$0x3] %vm804_vm0, %v241_v44  ;;  %v257_v52 = vadd.f32 %v256_v41, %v252_v45  ;;  %v272_v53 = vmul.f32 %v437_v43, %v271_v50  ;;  %v276_v54 = vstv %s438_s26  ;;  %p586_p2 = pnand %p585_p1, %p750_p9  ;;  %p591_p12 = por %p590_p11, %p589_p8 }
  0x3b   : > { %v277_v55 = vmul.f32 %v439_v48, %v276_v54  ;;  %v281_v56 = vstv %s440_s17 }
  0x3c   : > { %v262_v57 = vadd.f32 %v261_v46, %v257_v52  ;;  %v273_v58 = vadd.f32 %v272_v53, %v268_v49  ;;  %v282_v59 = vmul.f32 %v441_v51, %v281_v56  ;;  %p587_p4 = pneg %p586_p2 }
  0x3e   : > { %434 = vst.msk [vmem:[%s818_s24 + $0x2] ss:$4 sm:$0x3] %vm804_vm0, %v262_v57  ;;  %v278_v60 = vadd.f32 %v277_v55, %v273_v58  ;;  %p592_p13 = pnand %p591_p12, %p587_p4 }
  0x40   : > { %v283_v61 = vadd.f32 %v282_v59, %v278_v60 }
  0x42   : > { %442 = vst.msk [vmem:[%s818_s24 + $0x3] ss:$4 sm:$0x3] %vm804_vm0, %v283_v61 }
  0x43   : > { %595 = shalt.err (!%p592_p13)
}
  0x44   : > { %456 = dma.vmem_to_hbm [thread:$0]  (%p750_p9), %s303_s4, 128, %s305_s27, %s287_s5  }
  0x45 PF: > { %s316_s22 = sand.u32 1, %s634_s9   ;;  %p890_p0 = scmp.ge.s32.totalorder %s654_s14, 2 }
  0x46   : > { %s317_s18 = scalar_lea.sflag [#allocation4], %s316_s22 }
  0x47   : > { %p467_p3 = pnand %p890_p0, %p721_p6 }
  0x49   : > { %p468_p5 = pneg %p467_p3 }
  0x4b   : > { %629 = dma.done.wait (%p468_p5), %s317_s18, 128  }
  0x4c   : > { %631 = vsyncadd (%p468_p5), %s317_s18, 4294967168  ;;  %s19_s14 = sadd.s32 1, %s654_s14   ;;  %s891_s9 = smov %s638_s10 }
  0x4d   : > { %p16_p7 = scmp.ge.s32.totalorder %s19_s14, 4   ;;  %s892_s10 = smov %s642_s11 }
  0x4e   : > { %s893_s11 = smov %s756_s3  ;;  %s894_s12 = smov %s650_s13 }
  0x4f   : > { %s895_s13 = smov %s897_s25  ;;  %18 = sbr.rel (!%p16_p7) target bundleno = 7 (0x7), region = 84 }
  0x54   :  { %323 = vsyncpa [#allocation3], 1 }
  0x55   :  { %325 = vsyncpa [#allocation3 + $0x1], 1 }
  0x56   :  { %326 = vsyncpa [#allocation4], 1 }
  0x57   :  { %328 = vsyncpa [#allocation4 + $0x1], 1 }
  0x58   :  { %329 = vsyncpa [#allocation5], 1 }
  0x59   :  { %331 = vsyncpa [#allocation5 + $0x1], 1 }

</bundles_post_ra>
